<compile_context>
chip_gen: v7x
topology: tpu7x:2x2x1
jax: 0.10.0
libtpu: 0.0.40
codegen_flags: <defaults>
</compile_context>

<pallas_src>
import jax
import jax.numpy as jnp
from jax import lax
from jax.experimental import pallas as pl
from jax.experimental.pallas import tpu as pltpu


def target_block_kernel(x_ref, w1_ref, b1_ref, w2_ref, b2_ref, w3_ref, b3_ref,
                        out_ref, h3_ref):
    def conv_relu(x_bf16, w_ref, b_ref):
        # x_bf16: (Lin, Cin) bf16; w_ref: (K*Cin, Cout) bf16; b_ref: (1, Cout) f32.
        kc, _ = w_ref.shape
        lin, cin = x_bf16.shape
        k = kc // cin
        lout = lin - k + 1
        # im2col: K shifted slices concatenated along channels -> one MXU
        # matmul with contraction depth K*Cin (f32 accumulation).
        x_unf = jnp.concatenate([x_bf16[i:i + lout, :] for i in range(k)],
                                axis=1)
        y = jnp.dot(x_unf, w_ref[...], preferred_element_type=jnp.float32)
        return jnp.maximum(y + b_ref[...], 0.0)              # f32

    x = x_ref[0]                                             # (L, E) bf16
    h = conv_relu(x, w1_ref, b1_ref)                         # (L1, F)
    h = conv_relu(h.astype(jnp.bfloat16), w2_ref, b2_ref)    # (L2, 2F)
    h = conv_relu(h.astype(jnp.bfloat16), w3_ref, b3_ref)    # (L3, 3F)

    # MaxPool1d(kernel=2, stride=2), ceil_mode=False (tail row dropped):
    # pairwise max of two stride-2 sublane views of the VMEM scratch.
    h3_ref[...] = h
    l3, _ = h3_ref.shape
    lp = l3 // 2
    out_ref[0] = jnp.maximum(h3_ref[pl.ds(0, lp, 2), :],
                             h3_ref[pl.ds(1, lp, 2), :])


def _tile_bytes(shape, dtype):
    """Conservative padded-tile size estimate ((8,128) granularity)."""
    s = list(shape)
    if len(s) >= 2:
        s[-2] = ((s[-2] + 7) // 8) * 8
    s[-1] = ((s[-1] + 127) // 128) * 128
    n = 1
    for d in s:
        n *= d
    return n * jnp.dtype(dtype).itemsize


def target_block_forward(ids, emb, w1, b1, w2, b2, w3, b3):
    """ids: (B, L) int32; conv weights in (K, Cin, Cout) layout; biases (Cout,).

    Returns (B, 3*num_filters, Lp) f32, matching the PyTorch module.
    """
    B, L = ids.shape
    K, E, F1 = w1.shape
    F2 = w2.shape[2]
    F3 = w3.shape[2]
    L1 = L - K + 1
    L2 = L1 - K + 1
    L3 = L2 - K + 1
    Lp = L3 // 2

    # Embedding gather in XLA; bf16 activations for the MXU.
    x = jnp.take(emb, ids, axis=0).astype(jnp.bfloat16)          # (B, L, E)

    # im2col weight matrices (row index = k*Cin + cin, matching the in-kernel
    # concat order), bf16 operands; biases stay f32.
    w1m = w1.reshape(K * E, F1).astype(jnp.bfloat16)
    w2m = w2.reshape(K * F1, F2).astype(jnp.bfloat16)
    w3m = w3.reshape(K * F2, F3).astype(jnp.bfloat16)
    b1r = b1.reshape(1, F1).astype(jnp.float32)
    b2r = b2.reshape(1, F2).astype(jnp.float32)
    b3r = b3.reshape(1, F3).astype(jnp.float32)

    operand_tiles = [
        ((1, L, E), jnp.bfloat16),
        ((K * E, F1), jnp.bfloat16), ((1, F1), jnp.float32),
        ((K * F1, F2), jnp.bfloat16), ((1, F2), jnp.float32),
        ((K * F2, F3), jnp.bfloat16), ((1, F3), jnp.float32),
        ((1, Lp, F3), jnp.float32),
    ]
    vmem_bytes = 2 * sum(_tile_bytes(s, d) for s, d in operand_tiles)  # 2x buffers
    vmem_bytes += _tile_bytes((L3, F3), jnp.float32)                   # scratch
    vmem_limit = int(min(max(4 * vmem_bytes, 4 << 20), 32 << 20))      # headroom

    out_nlc = pl.pallas_call(
        target_block_kernel,
        out_shape=jax.ShapeDtypeStruct((B, Lp, F3), jnp.float32),
        grid_spec=pltpu.PrefetchScalarGridSpec(
            num_scalar_prefetch=0,
            grid=(B,),
            in_specs=[
                pl.BlockSpec((1, L, E), lambda b: (b, 0, 0)),      # activations
                pl.BlockSpec((K * E, F1), lambda b: (0, 0)),       # w1 (resident)
                pl.BlockSpec((1, F1), lambda b: (0, 0)),           # b1
                pl.BlockSpec((K * F1, F2), lambda b: (0, 0)),      # w2
                pl.BlockSpec((1, F2), lambda b: (0, 0)),           # b2
                pl.BlockSpec((K * F2, F3), lambda b: (0, 0)),      # w3
                pl.BlockSpec((1, F3), lambda b: (0, 0)),           # b3
            ],
            out_specs=pl.BlockSpec((1, Lp, F3), lambda b: (b, 0, 0)),
            scratch_shapes=[pltpu.VMEM((L3, F3), jnp.float32)],
        ),
        compiler_params=pltpu.CompilerParams(
            dimension_semantics=("parallel",),
            vmem_limit_bytes=vmem_limit,
        ),
    )(x, w1m, b1r, w2m, b2r, w3m, b3r)

    # NLC -> NCL (PyTorch layout). Tiny tensor; at production lengths the
    # kernel would write NCL directly instead (see TODO above).
    return jnp.transpose(out_nlc, (0, 2, 1))


def reference_forward(ids, emb, w1, b1, w2, b2, w3, b3):
    """Pure-JAX f32 reference matching the PyTorch module exactly."""
    x = emb[ids]                       # (B, L, E)
    x = jnp.transpose(x, (0, 2, 1))    # (B, E, L)

    def conv_relu(x, w_kio, bias):
        w_oik = jnp.transpose(w_kio, (2, 1, 0))  # (Cout, Cin, K) like nn.Conv1d
        y = lax.conv_general_dilated(x, w_oik, window_strides=(1,),
                                     padding='VALID',
                                     dimension_numbers=('NCH', 'OIH', 'NCH'))
        return jnp.maximum(y + bias[None, :, None], 0.0)

    x = conv_relu(x, w1, b1)
    x = conv_relu(x, w2, b2)
    x = conv_relu(x, w3, b3)
    B, C, L3 = x.shape
    Lp = L3 // 2
    return jnp.max(x[:, :, :2 * Lp].reshape(B, C, Lp, 2), axis=-1)


if __name__ == "__main__":
    # Small, deterministic configuration.
    target_dict_len = 25      # V
    embedding_size = 32       # E
    num_filters = 16          # F
    target_kernel_size = 4    # K
    batch = 2
    seq_len = 32              # L

    key = jax.random.PRNGKey(0)
    k_ids, k_emb, k_w1, k_b1, k_w2, k_b2, k_w3, k_b3 = jax.random.split(key, 8)

    ids = jax.random.randint(k_ids, (batch, seq_len), 0, target_dict_len,
                             dtype=jnp.int32)

    emb = 0.1 * jax.random.normal(k_emb, (target_dict_len, embedding_size),
                                  jnp.float32)
    # Conv weights stored as (K, Cin, Cout).
    w1 = 0.1 * jax.random.normal(
        k_w1, (target_kernel_size, embedding_size, num_filters), jnp.float32)
    b1 = 0.1 * jax.random.normal(k_b1, (num_filters,), jnp.float32)
    w2 = 0.1 * jax.random.normal(
        k_w2, (target_kernel_size, num_filters, 2 * num_filters), jnp.float32)
    b2 = 0.1 * jax.random.normal(k_b2, (2 * num_filters,), jnp.float32)
    w3 = 0.1 * jax.random.normal(
        k_w3, (target_kernel_size, 2 * num_filters, 3 * num_filters), jnp.float32)
    b3 = 0.1 * jax.random.normal(k_b3, (3 * num_filters,), jnp.float32)

    out = target_block_forward(ids, emb, w1, b1, w2, b2, w3, b3)
    out = jax.block_until_ready(out)

    ref = reference_forward(ids, emb, w1, b1, w2, b2, w3, b3)
    assert out.shape == ref.shape, (out.shape, ref.shape)
    # bf16 matmul operands (f32 accumulation) -> loosened tolerance vs f32 ref.
    assert bool(jnp.allclose(out, ref, rtol=2e-2, atol=1e-2)), \
        "mismatch vs reference"

    print("KERNEL_OK")
</pallas_src>

<mosaic_0001>
module attributes {stable_mosaic.version = 11 : i64} {
  func.func @target_block_kernel(%arg0: i32, %arg1: memref<1x32x32xbf16, #tpu.memory_space<vmem>>, %arg2: memref<128x16xbf16, #tpu.memory_space<vmem>>, %arg3: memref<1x16xf32, #tpu.memory_space<vmem>>, %arg4: memref<64x32xbf16, #tpu.memory_space<vmem>>, %arg5: memref<1x32xf32, #tpu.memory_space<vmem>>, %arg6: memref<128x48xbf16, #tpu.memory_space<vmem>>, %arg7: memref<1x48xf32, #tpu.memory_space<vmem>>, %arg8: memref<1x11x48xf32, #tpu.memory_space<vmem>>, %arg9: memref<23x48xf32, #tpu.memory_space<vmem>>) attributes {dimension_semantics = [#tpu.dimension_semantics<parallel>], iteration_bounds = array<i64: 2>, scalar_prefetch = 0 : i64, scratch_operands = 1 : i64, tpu.core_type = #tpu.core_type<tc>, window_params = [{transform_indices = @transform_0, window_bounds = array<i64: 1, 32, 32>}, {pipeline_mode = #tpu.pipeline_mode<synchronous>, transform_indices = @transform_1, window_bounds = array<i64: 128, 16>}, {pipeline_mode = #tpu.pipeline_mode<synchronous>, transform_indices = @transform_2, window_bounds = array<i64: 1, 16>}, {pipeline_mode = #tpu.pipeline_mode<synchronous>, transform_indices = @transform_3, window_bounds = array<i64: 64, 32>}, {pipeline_mode = #tpu.pipeline_mode<synchronous>, transform_indices = @transform_4, window_bounds = array<i64: 1, 32>}, {pipeline_mode = #tpu.pipeline_mode<synchronous>, transform_indices = @transform_5, window_bounds = array<i64: 128, 48>}, {pipeline_mode = #tpu.pipeline_mode<synchronous>, transform_indices = @transform_6, window_bounds = array<i64: 1, 48>}, {transform_indices = @transform_7, window_bounds = array<i64: 1, 11, 48>}]} {
    %c0 = arith.constant 0 : index
    %c0_0 = arith.constant 0 : index
    %c0_1 = arith.constant 0 : index
    %0 = vector.load %arg1[%c0, %c0_0, %c0_1] : memref<1x32x32xbf16, #tpu.memory_space<vmem>>, vector<1x32x32xbf16>
    %1 = vector.shape_cast %0 : vector<1x32x32xbf16> to vector<32x32xbf16>
    %2 = vector.extract_strided_slice %1 {offsets = [0, 0], sizes = [29, 32], strides = [1, 1]} : vector<32x32xbf16> to vector<29x32xbf16>
    %3 = vector.extract_strided_slice %1 {offsets = [1, 0], sizes = [29, 32], strides = [1, 1]} : vector<32x32xbf16> to vector<29x32xbf16>
    %4 = vector.extract_strided_slice %1 {offsets = [2, 0], sizes = [29, 32], strides = [1, 1]} : vector<32x32xbf16> to vector<29x32xbf16>
    %5 = vector.extract_strided_slice %1 {offsets = [3, 0], sizes = [29, 32], strides = [1, 1]} : vector<32x32xbf16> to vector<29x32xbf16>
    %6 = tpu.concatenate %2, %3, %4, %5 in 1 : vector<29x32xbf16>, vector<29x32xbf16>, vector<29x32xbf16>, vector<29x32xbf16> -> vector<29x128xbf16>
    %c0_2 = arith.constant 0 : index
    %c0_3 = arith.constant 0 : index
    %7 = vector.load %arg2[%c0_2, %c0_3] : memref<128x16xbf16, #tpu.memory_space<vmem>>, vector<128x16xbf16>
    %cst = arith.constant dense<0.000000e+00> : vector<29x16xf32>
    %8 = tpu.matmul %6, %7, %cst {dimension_numbers = #tpu.dot_dimension_numbers<[1], [0], [0], [1], [0, 0, 1, 1], [], []>} : vector<29x128xbf16>, vector<128x16xbf16>, vector<29x16xf32> -> vector<29x16xf32>
    %c0_4 = arith.constant 0 : index
    %c0_5 = arith.constant 0 : index
    %9 = vector.load %arg3[%c0_4, %c0_5] : memref<1x16xf32, #tpu.memory_space<vmem>>, vector<1x16xf32>
    %10 = vector.broadcast %9 : vector<1x16xf32> to vector<29x16xf32>
    %11 = arith.addf %8, %10 : vector<29x16xf32>
    %cst_6 = arith.constant 0.000000e+00 : f32
    %12 = vector.broadcast %cst_6 : f32 to vector<29x16xf32>
    %13 = arith.maximumf %11, %12 : vector<29x16xf32>
    %14 = arith.truncf %13 : vector<29x16xf32> to vector<29x16xbf16>
    %15 = vector.extract_strided_slice %14 {offsets = [0, 0], sizes = [26, 16], strides = [1, 1]} : vector<29x16xbf16> to vector<26x16xbf16>
    %16 = vector.extract_strided_slice %14 {offsets = [1, 0], sizes = [26, 16], strides = [1, 1]} : vector<29x16xbf16> to vector<26x16xbf16>
    %17 = vector.extract_strided_slice %14 {offsets = [2, 0], sizes = [26, 16], strides = [1, 1]} : vector<29x16xbf16> to vector<26x16xbf16>
    %18 = vector.extract_strided_slice %14 {offsets = [3, 0], sizes = [26, 16], strides = [1, 1]} : vector<29x16xbf16> to vector<26x16xbf16>
    %19 = tpu.concatenate %15, %16, %17, %18 in 1 : vector<26x16xbf16>, vector<26x16xbf16>, vector<26x16xbf16>, vector<26x16xbf16> -> vector<26x64xbf16>
    %c0_7 = arith.constant 0 : index
    %c0_8 = arith.constant 0 : index
    %20 = vector.load %arg4[%c0_7, %c0_8] : memref<64x32xbf16, #tpu.memory_space<vmem>>, vector<64x32xbf16>
    %cst_9 = arith.constant dense<0.000000e+00> : vector<26x32xf32>
    %21 = tpu.matmul %19, %20, %cst_9 {dimension_numbers = #tpu.dot_dimension_numbers<[1], [0], [0], [1], [0, 0, 1, 1], [], []>} : vector<26x64xbf16>, vector<64x32xbf16>, vector<26x32xf32> -> vector<26x32xf32>
    %c0_10 = arith.constant 0 : index
    %c0_11 = arith.constant 0 : index
    %22 = vector.load %arg5[%c0_10, %c0_11] : memref<1x32xf32, #tpu.memory_space<vmem>>, vector<1x32xf32>
    %23 = vector.broadcast %22 : vector<1x32xf32> to vector<26x32xf32>
    %24 = arith.addf %21, %23 : vector<26x32xf32>
    %cst_12 = arith.constant 0.000000e+00 : f32
    %25 = vector.broadcast %cst_12 : f32 to vector<26x32xf32>
    %26 = arith.maximumf %24, %25 : vector<26x32xf32>
    %27 = arith.truncf %26 : vector<26x32xf32> to vector<26x32xbf16>
    %28 = vector.extract_strided_slice %27 {offsets = [0, 0], sizes = [23, 32], strides = [1, 1]} : vector<26x32xbf16> to vector<23x32xbf16>
    %29 = vector.extract_strided_slice %27 {offsets = [1, 0], sizes = [23, 32], strides = [1, 1]} : vector<26x32xbf16> to vector<23x32xbf16>
    %30 = vector.extract_strided_slice %27 {offsets = [2, 0], sizes = [23, 32], strides = [1, 1]} : vector<26x32xbf16> to vector<23x32xbf16>
    %31 = vector.extract_strided_slice %27 {offsets = [3, 0], sizes = [23, 32], strides = [1, 1]} : vector<26x32xbf16> to vector<23x32xbf16>
    %32 = tpu.concatenate %28, %29, %30, %31 in 1 : vector<23x32xbf16>, vector<23x32xbf16>, vector<23x32xbf16>, vector<23x32xbf16> -> vector<23x128xbf16>
    %c0_13 = arith.constant 0 : index
    %c0_14 = arith.constant 0 : index
    %33 = vector.load %arg6[%c0_13, %c0_14] : memref<128x48xbf16, #tpu.memory_space<vmem>>, vector<128x48xbf16>
    %cst_15 = arith.constant dense<0.000000e+00> : vector<23x48xf32>
    %34 = tpu.matmul %32, %33, %cst_15 {dimension_numbers = #tpu.dot_dimension_numbers<[1], [0], [0], [1], [0, 0, 1, 1], [], []>} : vector<23x128xbf16>, vector<128x48xbf16>, vector<23x48xf32> -> vector<23x48xf32>
    %c0_16 = arith.constant 0 : index
    %c0_17 = arith.constant 0 : index
    %35 = vector.load %arg7[%c0_16, %c0_17] : memref<1x48xf32, #tpu.memory_space<vmem>>, vector<1x48xf32>
    %36 = vector.broadcast %35 : vector<1x48xf32> to vector<23x48xf32>
    %37 = arith.addf %34, %36 : vector<23x48xf32>
    %cst_18 = arith.constant 0.000000e+00 : f32
    %38 = vector.broadcast %cst_18 : f32 to vector<23x48xf32>
    %39 = arith.maximumf %37, %38 : vector<23x48xf32>
    %c0_19 = arith.constant 0 : index
    %c0_20 = arith.constant 0 : index
    %40 = vector.load %arg9[%c0_19, %c0_20] : memref<23x48xf32, #tpu.memory_space<vmem>>, vector<23x48xf32>
    tpu.vector_store %arg9[%c0_19, %c0_20], %39 {strides = array<i32>} : memref<23x48xf32, #tpu.memory_space<vmem>>, vector<23x48xf32>,
    %c0_21 = arith.constant 0 : index
    %c0_22 = arith.constant 0 : index
    %41 = tpu.strided_load %arg9[%c0_21, %c0_22] {strides = array<i32: 2, 1>} : memref<23x48xf32, #tpu.memory_space<vmem>>, vector<11x48xf32>
    %c1 = arith.constant 1 : index
    %c0_23 = arith.constant 0 : index
    %42 = tpu.strided_load %arg9[%c1, %c0_23] {strides = array<i32: 2, 1>} : memref<23x48xf32, #tpu.memory_space<vmem>>, vector<11x48xf32>
    %43 = arith.maximumf %41, %42 : vector<11x48xf32>
    %c0_24 = arith.constant 0 : index
    %c0_25 = arith.constant 0 : index
    %c0_26 = arith.constant 0 : index
    %44 = vector.load %arg8[%c0_24, %c0_25, %c0_26] : memref<1x11x48xf32, #tpu.memory_space<vmem>>, vector<1x11x48xf32>
    %45 = vector.shape_cast %44 : vector<1x11x48xf32> to vector<11x48xf32>
    %46 = vector.shape_cast %43 : vector<11x48xf32> to vector<1x11x48xf32>
    tpu.vector_store %arg8[%c0_24, %c0_25, %c0_26], %46 {strides = array<i32>} : memref<1x11x48xf32, #tpu.memory_space<vmem>>, vector<1x11x48xf32>,
    return
  }
  func.func @transform_0(%arg0: i32) -> (i32, i32, i32) {
    %c0_i32 = arith.constant 0 : i32
    %c0_i32_0 = arith.constant 0 : i32
    %c0_i32_1 = arith.constant 0 : i32
    return %arg0, %c0_i32, %c0_i32_0 : i32, i32, i32
  }
  func.func @transform_1(%arg0: i32) -> (i32, i32) {
    %c0_i32 = arith.constant 0 : i32
    %c0_i32_0 = arith.constant 0 : i32
    %c0_i32_1 = arith.constant 0 : i32
    return %c0_i32, %c0_i32_0 : i32, i32
  }
  func.func @transform_2(%arg0: i32) -> (i32, i32) {
    %c0_i32 = arith.constant 0 : i32
    %c0_i32_0 = arith.constant 0 : i32
    %c0_i32_1 = arith.constant 0 : i32
    return %c0_i32, %c0_i32_0 : i32, i32
  }
  func.func @transform_3(%arg0: i32) -> (i32, i32) {
    %c0_i32 = arith.constant 0 : i32
    %c0_i32_0 = arith.constant 0 : i32
    %c0_i32_1 = arith.constant 0 : i32
    return %c0_i32, %c0_i32_0 : i32, i32
  }
  func.func @transform_4(%arg0: i32) -> (i32, i32) {
    %c0_i32 = arith.constant 0 : i32
    %c0_i32_0 = arith.constant 0 : i32
    %c0_i32_1 = arith.constant 0 : i32
    return %c0_i32, %c0_i32_0 : i32, i32
  }
  func.func @transform_5(%arg0: i32) -> (i32, i32) {
    %c0_i32 = arith.constant 0 : i32
    %c0_i32_0 = arith.constant 0 : i32
    %c0_i32_1 = arith.constant 0 : i32
    return %c0_i32, %c0_i32_0 : i32, i32
  }
  func.func @transform_6(%arg0: i32) -> (i32, i32) {
    %c0_i32 = arith.constant 0 : i32
    %c0_i32_0 = arith.constant 0 : i32
    %c0_i32_1 = arith.constant 0 : i32
    return %c0_i32, %c0_i32_0 : i32, i32
  }
  func.func @transform_7(%arg0: i32) -> (i32, i32, i32) {
    %c0_i32 = arith.constant 0 : i32
    %c0_i32_0 = arith.constant 0 : i32
    %c0_i32_1 = arith.constant 0 : i32
    return %arg0, %c0_i32, %c0_i32_0 : i32, i32, i32
  }
}

</mosaic_0001>

<bundles_post_ra>
// kernel: tpu_custom_call.1
= control target key start
LH: loop header
LB: loop body
LE: loop exit
PB: predicated region body
PF: predicated region fallthrough
CT: control target
= control target key end

     0   :  { %s1080_s24 = smov 0   ;;  %s1217_s0 = inlined_call_operand.vmem [shape: bf16[2,32,32], index: 0, kind: input, shape index: {}]   ;;  %s1218_s1 = inlined_call_operand.vmem [shape: bf16[128,16], index: 1, kind: input, shape index: {}]   ;;  %s1219_s2 = inlined_call_operand.vmem [shape: f32[1,16], index: 2, kind: input, shape index: {}]   ;;  %s1220_s3 = inlined_call_operand.vmem [shape: bf16[64,32], index: 3, kind: input, shape index: {}]   ;;  %s1221_s4 = inlined_call_operand.vmem [shape: f32[1,32], index: 4, kind: input, shape index: {}]   ;;  %s1222_s5 = inlined_call_operand.vmem [shape: bf16[128,48], index: 5, kind: input, shape index: {}]   ;;  %s1223_s6 = inlined_call_operand.vmem [shape: f32[1,48], index: 6, kind: input, shape index: {}]   ;;  %s1224_s7 = inlined_call_operand.vmem [shape: f32[2,11,48], index: 7, kind: output, shape index: {}]  }
   0x1 LB: > { %s874_s25 = sadd.s32 4294967295, %s1033_s24   ;;  %p878_p0 = scmp.ge.s32.totalorder %s1033_s24, 1  ;;  %s1033_s24 = sphi %s1080_s24, %s17_s24  }
   0x2   : > { %p237_p1 = scmp.lt.s32.totalorder %s1033_s24, 3 }
   0x4   : > { %p238_p2 = pnand %p878_p0, %p237_p1 }
   0x5   : > { %p269_p3 = scmp.lt.s32.totalorder (!%p238_p2), %s874_s25, 1  ;;  %v1007_v0 = vld [vmem:[%s1218_s1] sm:$0xff] (!%p238_p2)   ;;  %v1008_v1 = vld [vmem:[%s1218_s1 + $0x8] sm:$0xff] (!%p238_p2)   ;;  %v1009_v2 = vld [vmem:[%s1218_s1 + $0x10] sm:$0xff] (!%p238_p2)   ;;  %vm294_vm0 = vsmask.f32 (!%p238_p2), 7424 }
   0x6   : > { %241 = sbr.rel (%p238_p2) target bundleno = 1076 (0x434), region = 48  ;;  %940 = vmatprep.subr.bf16.mxu0 (!%p238_p2), %v1007_v0  ;;  %vm314_vm1 = vcmask (!%p238_p2), 1046528   ;;  %v1010_v8 = vld [vmem:[%s1218_s1 + $0x18] sm:$0xff] (!%p238_p2)   ;;  %s1035_s15 = smov (!%p238_p2), 64   ;;  %v1011_v19 = vld [vmem:[%s1218_s1 + $0x20] sm:$0xff] (!%p238_p2)   ;;  %v1012_v23 = vld [vmem:[%s1218_s1 + $0x28] sm:$0xff] (!%p238_p2)  }
   0x7   : > { %941 = vmatpush3.bf16.msra.mxu0 (!%p238_p2), %v1007_v0  ;;  %s1036_s18 = smov (!%p238_p2), 32   ;;  %vm322_vm2 = vsmask.f32 (!%p238_p2), 6400  ;;  %s1037_s21 = smov (!%p238_p2), 96   ;;  %v1013_v26 = vld [vmem:[%s1218_s1 + $0x30] sm:$0xff] (!%p238_p2)   ;;  %v1014_v28 = vld [vmem:[%s1218_s1 + $0x38] sm:$0xff] (!%p238_p2)  }
   0x8   : > { %942 = vmatprep.subr.bf16.mxu0 (!%p238_p2), %v1008_v1  ;;  %vm334_vm3 = vcmask (!%p238_p2), 261120   ;;  %vm339_vm4 = vcmask (!%p238_p2), 523264   ;;  %vm344_vm5 = vcmask (!%p238_p2), 785408   ;;  %v1015_v41 = vld [vmem:[%s1220_s3] sm:$0xff] (!%p238_p2)   ;;  %v1016_v42 = vld [vmem:[%s1220_s3 + $0x8] sm:$0xff] (!%p238_p2)   ;;  %v1017_v45 = vld [vmem:[%s1220_s3 + $0x10] sm:$0xff] (!%p238_p2)  }
   0x9   : > { %960 = vmatprep.subr.bf16.mxu1 (!%p238_p2), %v1015_v41  ;;  %v885_v43 = vld [vmem:[%s1219_s2] ss:$0 sm:$0xff] (!%p238_p2)  ;;  %v1018_v53 = vld [vmem:[%s1220_s3 + $0x18] sm:$0xff] (!%p238_p2)   ;;  %s1038_s17 = smov (!%p238_p2), 16   ;;  %s1039_s19 = smov (!%p238_p2), 48   ;;  %vm516_vm6 = vcmask (!%p238_p2), 130048  }
   0xa   : > { %961 = vmatpush3.bf16.msra.mxu1 (!%p238_p2), %v1015_v41  ;;  %vm525_vm7 = vcmask (!%p238_p2), 392192   ;;  %vm805_vm8 = vcmask (!%p238_p2), 391168   ;;  %vm817_vm9 = vcmask (!%p238_p2), 387072  }
   0xb   : > { %943 = vmatpush3.bf16.msra.mxu0 (!%p238_p2), %v1008_v1  ;;  %962 = vmatprep.subr.bf16.mxu1 (!%p238_p2), %v1016_v42 }
   0xc   : > { %944 = vmatprep.subr.bf16.mxu0 (!%p238_p2), %v1009_v2 }
   0xd   : > { %s1226_s25 = smov (!%p269_p3, %s874_s25), 1 }
   0xe   : > { %s912_s30 = sshll.u32 %s1226_s25, 4  ;;  %963 = vmatpush3.bf16.msra.mxu1 %v1016_v42 }
   0xf   : > { %s273_s12 = scalar_lea.vmem %s1217_s0, %s912_s30  ;;  %945 = vmatpush3.bf16.msra.mxu0 %v1009_v2  ;;  %964 = vmatprep.subr.bf16.mxu1 %v1017_v45  ;;  %s278_s23 = scalar_lea.vmem %s1224_s7, %s912_s30 }
  0x10   : > { %v1005_v3 = vld [vmem:[%s273_s12 + $0x8] sm:$0xff]   ;;  %v1006_v4 = vld [vmem:[%s273_s12] sm:$0xff]   ;;  %946 = vmatprep.subr.bf16.mxu0 %v1010_v8 }
  0x11   : > { %v316_v5 = vrot.slane %v1005_v3, 1  ;;  %v303_v6 = vshll.u32 %v1005_v3, 16  ;;  %v307_v7 = vshrl.u32 %v1005_v3, 16  ;;  %v315_v9 = vrot.slane %v1006_v4, 1 }
  0x12   : > { %v296_v10 = vshrl.u32 %v1006_v4, 16  ;;  %v298_v11 = vshll.u32 %v1006_v4, 16  ;;  %965 = vmatpush3.bf16.msra.mxu1 %v1017_v45 }
  0x13   : > { %320 = vrot.lane.b32.xlu1 %v316_v5, %s1035_s15  ;;  %v305_v12 = vrot.slane %v303_v6, 1  ;;  %v326_v13 = vrot.slane %v307_v7, 1  ;;  %v327_v14 = vrot.slane %v303_v6, 2  ;;  %v317_v15 = vsel %vm314_vm1, %v315_v9, %v316_v5  ;;  %947 = vmatpush3.bf16.msra.mxu0 %v1010_v8 }
  0x14   : > { %v300_v16 = vrot.slane %v298_v11, 1  ;;  %v323_v17 = vrot.slane %v296_v10, 1  ;;  %v324_v18 = vrot.slane %v298_v11, 2  ;;  %948 = vmatprep.subr.bf16.mxu0 %v1011_v19  ;;  %966 = vmatprep.subr.bf16.mxu1 %v1018_v53 }
  0x15   : > { %v309_v20 = vor.u32 %v307_v7, %v305_v12  ;;  %v328_v22 = vor.u32 %v327_v14, %v326_v13 }
  0x16   : > { %v301_v21 = vor.u32 %v300_v16, %v296_v10  ;;  %v325_v25 = vor.u32 %v324_v18, %v323_v17  ;;  %967 = vmatpush3.bf16.msra.mxu1 %v1018_v53 }
  0x17   : > { %312 = vrot.lane.b32.xlu0 %v309_v20, %s1036_s18  ;;  %318 = vrot.lane.b32.xlu1 %v317_v15, %s1035_s15 }
  0x18   : > { %v306_v24 = vsel %vm294_vm0, %v301_v21, %v305_v12  ;;  %v329_v27 = vsel %vm322_vm2, %v325_v25, %v328_v22  ;;  %949 = vmatpush3.bf16.msra.mxu0 %v1011_v19 }
  0x19   : > { %950 = vmatprep.subr.bf16.mxu0 %v1012_v23 }
  0x1b   : > { %332 = vrot.lane.b32.xlu1 %v328_v22, %s1037_s21  ;;  %310 = vrot.lane.b32.xlu0 %v306_v24, %s1036_s18 }
  0x1c   : > { %951 = vmatpush3.bf16.msra.mxu0 %v1012_v23 }
  0x1d   : > { %952 = vmatprep.subr.bf16.mxu0 %v1013_v26 }
  0x1f   : > { %330 = vrot.lane.b32.xlu0 %v329_v27, %s1037_s21  ;;  %v1019_v27 = vld [vmem:[%s1222_s5] sm:$0xff]  }
  0x20   : > { %953 = vmatpush3.bf16.msra.mxu0 %v1013_v26  ;;  %972 = vmatprep.subr.bf16.mxu1 %v1019_v27 }
  0x21   : > { %954 = vmatprep.subr.bf16.mxu0 %v1014_v28 }
  0x24   : > { %955 = vmatpush3.bf16.msra.mxu0 %v1014_v28  ;;  %v1020_v28 = vld [vmem:[%s1222_s5 + $0x8] sm:$0xff]  }
  0x85   : > { %v321_v29 = vpop.permute.xlu1 %320 }
  0x89   : > { %v313_v30 = vpop.permute.xlu0 %312  ;;  %v319_v31 = vpop.permute.xlu1 %318 }
  0x8a   : > { %v338_v34 = vsel %vm334_vm3, %v1005_v3, %v313_v30  ;;  %v1022_v30 = vld [vmem:[%s1222_s5 + $0x18] sm:$0xff]  }
  0x8b   : > { %v343_v39 = vsel %vm339_vm4, %v338_v34, %v321_v29  ;;  %v1021_v29 = vld [vmem:[%s1222_s5 + $0x10] sm:$0xff]  }
  0x8d   : > { %v311_v32 = vpop.permute.xlu0 %310  ;;  %v333_v35 = vpop.permute.xlu1 %332 }
  0x8e   : > { %v336_v33 = vsel %vm334_vm3, %v1006_v4, %v311_v32  ;;  %v349_v40 = vsel %vm344_vm5, %v343_v39, %v333_v35  ;;  %v1024_v32 = vld [vmem:[%s1222_s5 + $0x28] sm:$0xff]   ;;  %v1025_v35 = vld [vmem:[%s1222_s5 + $0x30] sm:$0xff]  }
  0x8f   : > { %v341_v37 = vsel %vm339_vm4, %v336_v33, %v319_v31  ;;  %v1023_v31 = vld [vmem:[%s1222_s5 + $0x20] sm:$0xff]  }
  0x90   : > { %v894_v33 = vld [vmem:[%s1221_s4] ss:$0 sm:$0xff] }
  0x91   : > { %v331_v36 = vpop.permute.xlu0 %330 }
  0x92   : > { %v346_v38 = vsel %vm344_vm5, %v341_v37, %v331_v36 }
  0x93   : > { %956 = vmatprep.mubr.bf16.mxu0 %v346_v38 }
  0x94   : > { %957 = vmatmul.mubr.bf16.vlgmr.msra.gmra.mrb[0].mxu0 %v349_v40 }
 0x167   : > { %v958_v44 = vpop.f32.mrb[0].mxu0 }
 0x168   : > { %v465_v46 = vadd.f32 %v958_v44, %v885_v43  ;;  %v456_v47 = vpop.f32.mrb[1].mxu0 }
 0x169   : > { %v457_v48 = vadd.f32 %v885_v43, %v456_v47  ;;  %v959_v49 = vpop.f32.mrb[2].mxu0 }
 0x16a   : > { %v468_v50 = vadd.f32 %v959_v49, %v885_v43  ;;  %v459_v51 = vpop.f32.mrb[3].mxu0  ;;  %v473_v54 = vmax.f32 %v465_v46, 0.0 }
 0x16b   : > { %v460_v52 = vadd.f32 %v885_v43, %v459_v51  ;;  %v471_v56 = vmax.f32 %v457_v48, 0.0  ;;  %v1026_v43 = vld [vmem:[%s1222_s5 + $0x38] sm:$0xff]  }
 0x16c   : > { %v474_v55 = vmax.f32 %v468_v50, 0.0 }
 0x16d   : > { %v472_v57 = vmax.f32 %v460_v52, 0.0 }
 0x16e   : > { %v476_v58 = vpack.c.bf16 %v474_v55, %v473_v54 }
 0x16f   : > { %v475_v59 = vpack.c.bf16 %v472_v57, %v471_v56 }
 0x170   : > { %v499_v60 = vrot.slane %v476_v58, 1  ;;  %v485_v61 = vshll.u32 %v476_v58, 16  ;;  %v489_v62 = vshrl.u32 %v476_v58, 16 }
 0x171   : > { %v498_v63 = vrot.slane %v475_v59, 1  ;;  %v478_v0 = vshrl.u32 %v475_v59, 16  ;;  %v480_v1 = vshll.u32 %v475_v59, 16 }
 0x172   : > { %503 = vrot.lane.b32.xlu1 %v499_v60, %s1036_s18  ;;  %v487_v2 = vrot.slane %v485_v61, 1  ;;  %v508_v3 = vrot.slane %v489_v62, 1  ;;  %v509_v4 = vrot.slane %v485_v61, 2 }
 0x173   : > { %v500_v5 = vsel %vm314_vm1, %v498_v63, %v499_v60  ;;  %v482_v6 = vrot.slane %v480_v1, 1  ;;  %v505_v7 = vrot.slane %v478_v0, 1  ;;  %v506_v8 = vrot.slane %v480_v1, 2 }
 0x174   : > { %501 = vrot.lane.b32.xlu0 %v500_v5, %s1036_s18  ;;  %v491_v9 = vor.u32 %v489_v62, %v487_v2  ;;  %v510_v12 = vor.u32 %v509_v4, %v508_v3 }
 0x175   : > { %v483_v10 = vor.u32 %v482_v6, %v478_v0  ;;  %v507_v13 = vor.u32 %v506_v8, %v505_v7 }
 0x176   : > { %494 = vrot.lane.b32.xlu1 %v491_v9, %s1038_s17 }
 0x177   : > { %v488_v11 = vsel %vm294_vm0, %v483_v10, %v487_v2  ;;  %v511_v14 = vsel %vm322_vm2, %v507_v13, %v510_v12 }
 0x178   : > { %492 = vrot.lane.b32.xlu0 %v488_v11, %s1038_s17 }
 0x17a   : > { %514 = vrot.lane.b32.xlu1 %v510_v12, %s1039_s19 }
 0x17c   : > { %512 = vrot.lane.b32.xlu0 %v511_v14, %s1039_s19 }
 0x1e4   : > { %v504_v15 = vpop.permute.xlu1 %503 }
 0x1e6   : > { %v502_v16 = vpop.permute.xlu0 %501 }
 0x1e8   : > { %v495_v17 = vpop.permute.xlu1 %494 }
 0x1e9   : > { %v520_v20 = vsel %vm516_vm6, %v476_v58, %v495_v17  ;;  %v901_v17 = vld [vmem:[%s1223_s6] ss:$0 sm:$0xff] }
 0x1ea   : > { %v493_v18 = vpop.permute.xlu0 %492  ;;  %v524_v24 = vsel %vm334_vm3, %v520_v20, %v504_v15 }
 0x1eb   : > { %v518_v19 = vsel %vm516_vm6, %v475_v59, %v493_v18 }
 0x1ec   : > { %v515_v21 = vpop.permute.xlu1 %514  ;;  %v522_v23 = vsel %vm334_vm3, %v518_v19, %v502_v16 }
 0x1ed   : > { %v529_v26 = vsel %vm525_vm7, %v524_v24, %v515_v21 }
 0x1ee   : > { %v513_v22 = vpop.permute.xlu0 %512 }
 0x1ef   : > { %v527_v25 = vsel %vm525_vm7, %v522_v23, %v513_v22 }
 0x1f0   : > { %968 = vmatprep.mubr.msk.bf16.mxu1 %vm339_vm4, %v527_v25 }
 0x1f1   : > { %969 = vmatmul.mubr.msk.bf16.vlgmr.msra.gmra.mrb[0].mxu1 %vm339_vm4, %v529_v26 }
 0x1f2   : > { %973 = vmatpush3.bf16.msra.mxu1 %v1019_v27 }
 0x1f3   : > { %974 = vmatprep.subr.bf16.mxu1 %v1020_v28 }
 0x1f6   : > { %975 = vmatpush3.bf16.msra.mxu1 %v1020_v28 }
 0x1f7   : > { %976 = vmatprep.subr.bf16.mxu1 %v1021_v29 }
 0x1fa   : > { %977 = vmatpush3.bf16.msra.mxu1 %v1021_v29 }
 0x1fb   : > { %978 = vmatprep.subr.bf16.mxu1 %v1022_v30 }
 0x1fe   : > { %979 = vmatpush3.bf16.msra.mxu1 %v1022_v30 }
 0x1ff   : > { %980 = vmatprep.subr.bf16.mxu1 %v1023_v31 }
 0x202   : > { %981 = vmatpush3.bf16.msra.mxu1 %v1023_v31 }
 0x203   : > { %982 = vmatprep.subr.bf16.mxu1 %v1024_v32 }
 0x206   : > { %983 = vmatpush3.bf16.msra.mxu1 %v1024_v32 }
 0x207   : > { %984 = vmatprep.subr.bf16.mxu1 %v1025_v35 }
 0x20a   : > { %985 = vmatpush3.bf16.msra.mxu1 %v1025_v35 }
 0x20b   : > { %986 = vmatprep.subr.bf16.mxu1 %v1026_v43 }
 0x20e   : > { %987 = vmatpush3.bf16.msra.mxu1 %v1026_v43 }
 0x2c4   : > { %v970_v34 = vpop.f32.mrb[0].mxu1 }
 0x2c5   : > { %v616_v36 = vadd.f32 %v970_v34, %v894_v33  ;;  %v607_v37 = vpop.f32.mrb[1].mxu1 }
 0x2c6   : > { %v608_v38 = vadd.f32 %v894_v33, %v607_v37  ;;  %v971_v39 = vpop.f32.mrb[2].mxu1 }
 0x2c7   : > { %v619_v40 = vadd.f32 %v971_v39, %v894_v33  ;;  %v610_v41 = vpop.f32.mrb[3].mxu1  ;;  %v624_v44 = vmax.f32 %v616_v36, 0.0 }
 0x2c8   : > { %v611_v42 = vadd.f32 %v894_v33, %v610_v41  ;;  %v622_v46 = vmax.f32 %v608_v38, 0.0 }
 0x2c9   : > { %v625_v45 = vmax.f32 %v619_v40, 0.0 }
 0x2ca   : > { %v623_v47 = vmax.f32 %v611_v42, 0.0 }
 0x2cb   : > { %v627_v48 = vpack.c.bf16 %v625_v45, %v624_v44 }
 0x2cc   : > { %v626_v49 = vpack.c.bf16 %v623_v47, %v622_v46 }
 0x2cd   : > { %v650_v50 = vrot.slane %v627_v48, 1  ;;  %v636_v51 = vshll.u32 %v627_v48, 16  ;;  %v640_v52 = vshrl.u32 %v627_v48, 16 }
 0x2ce   : > { %v649_v53 = vrot.slane %v626_v49, 1  ;;  %v629_v54 = vshrl.u32 %v626_v49, 16  ;;  %v631_v55 = vshll.u32 %v626_v49, 16 }
 0x2cf   : > { %654 = vrot.lane.b32.xlu1 %v650_v50, %s1035_s15  ;;  %v638_v56 = vrot.slane %v636_v51, 1  ;;  %v659_v57 = vrot.slane %v640_v52, 1  ;;  %v660_v58 = vrot.slane %v636_v51, 2 }
 0x2d0   : > { %v651_v59 = vsel %vm314_vm1, %v649_v53, %v650_v50  ;;  %v633_v60 = vrot.slane %v631_v55, 1  ;;  %v656_v61 = vrot.slane %v629_v54, 1  ;;  %v657_v62 = vrot.slane %v631_v55, 2 }
 0x2d1   : > { %652 = vrot.lane.b32.xlu0 %v651_v59, %s1035_s15  ;;  %v642_v63 = vor.u32 %v640_v52, %v638_v56  ;;  %v661_v2 = vor.u32 %v660_v58, %v659_v57 }
 0x2d2   : > { %v634_v0 = vor.u32 %v633_v60, %v629_v54  ;;  %v658_v3 = vor.u32 %v657_v62, %v656_v61 }
 0x2d3   : > { %645 = vrot.lane.b32.xlu1 %v642_v63, %s1036_s18 }
 0x2d4   : > { %v639_v1 = vsel %vm294_vm0, %v634_v0, %v638_v56  ;;  %v662_v4 = vsel %vm322_vm2, %v658_v3, %v661_v2 }
 0x2d5   : > { %643 = vrot.lane.b32.xlu0 %v639_v1, %s1036_s18 }
 0x2d7   : > { %665 = vrot.lane.b32.xlu1 %v661_v2, %s1037_s21 }
 0x2d9   : > { %663 = vrot.lane.b32.xlu0 %v662_v4, %s1037_s21 }
 0x341   : > { %v655_v5 = vpop.permute.xlu1 %654 }
 0x343   : > { %v653_v6 = vpop.permute.xlu0 %652 }
 0x345   : > { %v646_v7 = vpop.permute.xlu1 %645 }
 0x346   : > { %v670_v10 = vsel %vm334_vm3, %v627_v48, %v646_v7 }
 0x347   : > { %v644_v8 = vpop.permute.xlu0 %643  ;;  %v674_v14 = vsel %vm339_vm4, %v670_v10, %v655_v5 }
 0x348   : > { %v668_v9 = vsel %vm334_vm3, %v626_v49, %v644_v8 }
 0x349   : > { %v666_v11 = vpop.permute.xlu1 %665  ;;  %v672_v13 = vsel %vm339_vm4, %v668_v9, %v653_v6 }
 0x34a   : > { %v679_v16 = vsel %vm344_vm5, %v674_v14, %v666_v11 }
 0x34b   : > { %v664_v12 = vpop.permute.xlu0 %663 }
 0x34c   : > { %v676_v15 = vsel %vm344_vm5, %v672_v13, %v664_v12 }
 0x34d   : > { %988 = vmatprep.mubr.bf16.mxu1 %v676_v15 }
 0x34e   : > { %989 = vmatmul.mubr.bf16.vlgmr.msra.gmra.mrb[4].mxu1 %v679_v16 }
 0x421   : > { %v990_v18 = vpop.f32.mrb[4].mxu1 }
 0x422   : > { %v795_v19 = vadd.f32 %v990_v18, %v901_v17  ;;  %v786_v20 = vpop.f32.mrb[5].mxu1 }
 0x423   : > { %v787_v21 = vadd.f32 %v901_v17, %v786_v20  ;;  %v991_v22 = vpop.f32.mrb[6].mxu1 }
 0x424   : > { %v802_v23 = vmax.f32 %v795_v19, 0.0  ;;  %v789_v24 = vpop.f32.mrb[7].mxu1 }
 0x425   : > { %v800_v25 = vmax.f32 %v787_v21, 0.0  ;;  %v790_v26 = vadd.f32 %v901_v17, %v789_v24 }
 0x426   : > { %806 = vst.msk [vmem:[#allocation2 + $0x10] sm:$0x7f] %vm805_vm8, %v802_v23 }
 0x427   : > { %803 = vst.msk [vmem:[#allocation2] sm:$0xff] %vm525_vm7, %v800_v25  ;;  %v801_v27 = vmax.f32 %v790_v26, 0.0 }
 0x429   : > { %804 = vst.msk [vmem:[#allocation2 + $0x8] sm:$0xff] %vm525_vm7, %v801_v27 }
 0x42d   : > { %v809_v28 = vld [vmem:[#allocation2 + $0x10] ss:$2 sm:$0x7]  ;;  %v813_v29 = vld [vmem:[#allocation2 + $0x11] ss:$2 sm:$0x7] }
 0x42e   : > { %v815_v30 = vmax.f32 %v809_v28, %v813_v29 }
 0x430   : > { %818 = vst.msk [vmem:[%s278_s23 + $0x8] sm:$0x7] %vm817_vm9, %v815_v30  ;;  %v807_v31 = vld [vmem:[#allocation2] ss:$2 sm:$0xff]  ;;  %v811_v32 = vld [vmem:[#allocation2 + $0x1] ss:$2 sm:$0xff] }
 0x431   : > { %v814_v33 = vmax.f32 %v807_v31, %v811_v32 }
 0x433   : > { %816 = vst.msk [vmem:[%s278_s23] sm:$0xff] %vm525_vm7, %v814_v33 }
 0x434 PF: > { %s17_s24 = sadd.s32 1, %s1033_s24  }
 0x435   : > { %p14_p4 = scmp.ge.s32.totalorder %s17_s24, 4  }
 0x437   :  { %16 = sbr.rel (!%p14_p4) target bundleno = 1 (0x1), region = 81 }

</bundles_post_ra>
